<compile_context>
chip_gen: v6e
topology: v6e:2x2x1
jax: 0.10.0
libtpu: 0.0.40
codegen_flags: <defaults>
</compile_context>

<pallas_src>
import functools

import jax
import jax.numpy as jnp
import numpy as np
from jax import lax
from jax.experimental import pallas as pl
from jax.experimental.pallas import tpu as pltpu

K1, PAD1 = 31, 15
K2, PAD2 = 3, 1
HALO = 16  # PAD1 + 1: conv2 needs one extra conv1 output position per side


def _resblock_kernel(x_ref, w1_ref, b1_ref, w2_ref, b2_ref, o_ref,
                     *, lt, l_total):
    # x_ref : (1, C, L + 2*HALO) padded input row for this batch element (f32)
    # w1_ref: (C, K1*C) bf16     folded conv1 weights, rows ordered (tap, cin)
    # b1_ref: (C, 1)    f32      folded conv1 bias (conv bias + BN)
    # w2_ref: (C, K2*C) bf16
    # b2_ref: (C, 1)    f32
    # o_ref : (1, C, lt)
    t = pl.program_id(1)
    le = lt + 2                       # conv1 evaluated on [l0-1, l0+lt]
    win = lt + 2 * HALO

    l0 = pl.multiple_of(t * lt, 128)  # tile start (original coordinates)
    xw = x_ref[0, :, pl.ds(l0, win)]  # (C, win) f32, includes both halos
    xw_bf = xw.astype(jnp.bfloat16)

    # ---- conv1: im2col packs all K1 taps into one 496-deep bf16 matmul ----
    # result column e holds output position (l0 - 1 + e); tap k of that
    # position reads window column e + k.
    im2col = jnp.concatenate([xw_bf[:, k:k + le] for k in range(K1)], axis=0)
    h = jnp.dot(w1_ref[...], im2col, preferred_element_type=jnp.float32)
    h = jnp.maximum(h + b1_ref[...], 0.0)        # folded BN1 bias + ReLU (f32)

    # zero the extended positions outside [0, L): conv2 zero-pads h there.
    pos = l0 - 1 + lax.broadcasted_iota(jnp.int32, (1, le), 1)
    h = jnp.where(jnp.logical_and(pos >= 0, pos < l_total), h, 0.0)

    # ---- conv2: pack its 3 taps into one 48-deep bf16 matmul ----
    h_bf = h.astype(jnp.bfloat16)
    cols2 = jnp.concatenate([h_bf[:, k:k + lt] for k in range(K2)], axis=0)
    y = jnp.dot(w2_ref[...], cols2, preferred_element_type=jnp.float32)
    y = jnp.maximum(y + b2_ref[...], 0.0)        # folded BN2 bias + ReLU (f32)

    # ---- residual add in f32 (original x read from the same window) ----
    o_ref[0] = (y + xw[:, HALO:HALO + lt]).astype(o_ref.dtype)


def res_block(x_ncl, params, *, lt=256, vmem_limit_bytes=32 * 1024 * 1024):
    """x_ncl: (N, C, L) float32 in the PyTorch NCL layout; returns (N, C, L)."""
    n, c, l = x_ncl.shape
    if lt % 128 != 0 or l % lt != 0:
        raise ValueError("L must be a multiple of the lane-aligned tile size")
    nt = l // lt
    lp = l + 2 * HALO
    # Single cheap pad copy; per-step HBM traffic is just one input block per n.
    xpad = jnp.pad(x_ncl, ((0, 0), (0, 0), (HALO, HALO)))

    kernel = functools.partial(_resblock_kernel, lt=lt, l_total=l)
    grid_spec = pltpu.PrefetchScalarGridSpec(
        num_scalar_prefetch=0,
        grid=(n, nt),
        in_specs=[
            # whole padded row; block index is constant in the L-tile axis, so
            # it is fetched once per batch element and reused by every tile.
            pl.BlockSpec((1, c, lp), lambda i, j: (i, 0, 0)),
            pl.BlockSpec((c, K1 * c), lambda i, j: (0, 0)),
            pl.BlockSpec((c, 1), lambda i, j: (0, 0)),
            pl.BlockSpec((c, K2 * c), lambda i, j: (0, 0)),
            pl.BlockSpec((c, 1), lambda i, j: (0, 0)),
        ],
        out_specs=pl.BlockSpec((1, c, lt), lambda i, j: (i, 0, j)),
    )
    return pl.pallas_call(
        kernel,
        out_shape=jax.ShapeDtypeStruct((n, c, l), x_ncl.dtype),
        grid_spec=grid_spec,
        compiler_params=pltpu.CompilerParams(
            dimension_semantics=("parallel", "parallel"),
            vmem_limit_bytes=vmem_limit_bytes),
    )(xpad, params["w1"], params["b1"], params["w2"], params["b2"])


# ---------------------------------------------------------------------------
# Parameters (deterministic) and references.
# ---------------------------------------------------------------------------
def _flatten_conv_weight(w):
    # (Cout, Cin, K) -> (Cout, K*Cin), row index = k*Cin + cin (im2col order).
    return jnp.transpose(w, (0, 2, 1)).reshape(w.shape[0], -1)


def make_params(key, c, eps=1e-5):
    ks = jax.random.split(key, 12)
    w1 = jax.random.normal(ks[0], (c, c, K1), jnp.float32) * 0.05
    b1 = jax.random.normal(ks[1], (c,), jnp.float32) * 0.05
    w2 = jax.random.normal(ks[2], (c, c, K2), jnp.float32) * 0.05
    b2 = jax.random.normal(ks[3], (c,), jnp.float32) * 0.05
    g1 = 1.0 + 0.1 * jax.random.normal(ks[4], (c,), jnp.float32)
    be1 = 0.1 * jax.random.normal(ks[5], (c,), jnp.float32)
    m1 = 0.1 * jax.random.normal(ks[6], (c,), jnp.float32)
    v1 = jnp.abs(1.0 + 0.1 * jax.random.normal(ks[7], (c,), jnp.float32))
    g2 = 1.0 + 0.1 * jax.random.normal(ks[8], (c,), jnp.float32)
    be2 = 0.1 * jax.random.normal(ks[9], (c,), jnp.float32)
    m2 = 0.1 * jax.random.normal(ks[10], (c,), jnp.float32)
    v2 = jnp.abs(1.0 + 0.1 * jax.random.normal(ks[11], (c,), jnp.float32))

    # Fold conv bias + eval-mode BN into the conv weights / per-channel bias:
    #   BN(W.x + b) = (s*W).x + (s*(b - mean) + beta),  s = gamma/sqrt(var+eps)
    s1 = g1 / jnp.sqrt(v1 + eps)
    s2 = g2 / jnp.sqrt(v2 + eps)
    wf1 = w1 * s1[:, None, None]
    wf2 = w2 * s2[:, None, None]
    bias1 = (b1 - m1) * s1 + be1
    bias2 = (b2 - m2) * s2 + be2

    wf1_bf = wf1.astype(jnp.bfloat16)   # bf16 MXU operands (perf review);
    wf2_bf = wf2.astype(jnp.bfloat16)   # bias / residual math stays f32.

    kernel_params = dict(
        w1=_flatten_conv_weight(wf1_bf), b1=bias1.reshape(c, 1),
        w2=_flatten_conv_weight(wf2_bf), b2=bias2.reshape(c, 1))
    raw_params = dict(w1=w1, b1=b1, w2=w2, b2=b2, g1=g1, be1=be1, m1=m1, v1=v1,
                      g2=g2, be2=be2, m2=m2, v2=v2, eps=eps)
    folded_params = dict(w1=wf1_bf.astype(jnp.float32), b1=bias1,
                         w2=wf2_bf.astype(jnp.float32), b2=bias2)
    return kernel_params, raw_params, folded_params


def _conv1d(x, w, pad, precision=None):
    return lax.conv_general_dilated(
        x, w, window_strides=(1,), padding=[(pad, pad)],
        dimension_numbers=("NCH", "OIH", "NCH"), precision=precision)


def reference_f32(x, rp):
    """Exact f32 PyTorch forward (eval-mode BN)."""
    def bn(z, g, be, m, v):
        return (z - m[None, :, None]) / jnp.sqrt(v[None, :, None] + rp["eps"]) \
            * g[None, :, None] + be[None, :, None]
    hp = lax.Precision.HIGHEST
    h = _conv1d(x, rp["w1"], PAD1, hp) + rp["b1"][None, :, None]
    h = jax.nn.relu(bn(h, rp["g1"], rp["be1"], rp["m1"], rp["v1"]))
    y = _conv1d(h, rp["w2"], PAD2, hp) + rp["b2"][None, :, None]
    y = jax.nn.relu(bn(y, rp["g2"], rp["be2"], rp["m2"], rp["v2"]))
    return y + x


def reference_mixed(x, fp):
    """Same forward with conv operands rounded to bf16 (f32 accumulation) —
    exactly the precision the kernel uses on the MXU."""
    xb = x.astype(jnp.bfloat16).astype(jnp.float32)
    h = jax.nn.relu(_conv1d(xb, fp["w1"], PAD1) + fp["b1"][None, :, None])
    hb = h.astype(jnp.bfloat16).astype(jnp.float32)
    y = jax.nn.relu(_conv1d(hb, fp["w2"], PAD2) + fp["b2"][None, :, None])
    return y + x


if __name__ == "__main__":
    N, C, L = 2, 16, 1024  # in_channels == out_channels (residual add requires it)
    LT = 256               # lane-aligned length tile -> grid = (2, 4)
    key = jax.random.PRNGKey(0)
    kx, kp = jax.random.split(key)
    x = jax.random.normal(kx, (N, C, L), jnp.float32)  # PyTorch NCL layout
    kernel_params, raw_params, folded_params = make_params(kp, C)

    out = jax.block_until_ready(res_block(x, kernel_params, lt=LT))

    # Tight check vs. a reference using the kernel's exact MXU precision
    # (bf16 operands, f32 accumulation, f32 bias/ReLU/residual).
    np.testing.assert_allclose(np.asarray(out),
                               np.asarray(reference_mixed(x, folded_params)),
                               rtol=5e-3, atol=5e-3)
    # Loose check vs. the exact f32 PyTorch (eval-mode BN) forward; only the
    # bf16 rounding of the conv operands separates the two.
    np.testing.assert_allclose(np.asarray(out),
                               np.asarray(reference_f32(x, raw_params)),
                               rtol=2e-2, atol=2e-2)
    print("KERNEL_OK")
</pallas_src>

<mosaic_0001>
module attributes {stable_mosaic.version = 11 : i64} {
  func.func @_resblock_kernel(%arg0: i32, %arg1: i32, %arg2: memref<1x16x1056xf32, #tpu.memory_space<vmem>>, %arg3: memref<16x496xbf16, #tpu.memory_space<vmem>>, %arg4: memref<16x1xf32, #tpu.memory_space<vmem>>, %arg5: memref<16x48xbf16, #tpu.memory_space<vmem>>, %arg6: memref<16x1xf32, #tpu.memory_space<vmem>>, %arg7: memref<1x16x256xf32, #tpu.memory_space<vmem>>) attributes {dimension_semantics = [#tpu.dimension_semantics<parallel>, #tpu.dimension_semantics<parallel>], iteration_bounds = array<i64: 2, 4>, scalar_prefetch = 0 : i64, scratch_operands = 0 : i64, tpu.core_type = #tpu.core_type<tc>, window_params = [{transform_indices = @transform_0, window_bounds = array<i64: 1, 16, 1056>}, {pipeline_mode = #tpu.pipeline_mode<synchronous>, transform_indices = @transform_1, window_bounds = array<i64: 16, 496>}, {pipeline_mode = #tpu.pipeline_mode<synchronous>, transform_indices = @transform_2, window_bounds = array<i64: 16, 1>}, {pipeline_mode = #tpu.pipeline_mode<synchronous>, transform_indices = @transform_3, window_bounds = array<i64: 16, 48>}, {pipeline_mode = #tpu.pipeline_mode<synchronous>, transform_indices = @transform_4, window_bounds = array<i64: 16, 1>}, {transform_indices = @transform_5, window_bounds = array<i64: 1, 16, 256>}]} {
    %c256_i32 = arith.constant 256 : i32
    %0 = arith.muli %arg1, %c256_i32 : i32
    %1 = tpu.assume_multiple %0, 128 : i32
    %c0 = arith.constant 0 : index
    %c0_0 = arith.constant 0 : index
    %2 = arith.index_cast %1 : i32 to index
    %3 = vector.load %arg2[%c0, %c0_0, %2] : memref<1x16x1056xf32, #tpu.memory_space<vmem>>, vector<1x16x288xf32>
    %4 = vector.shape_cast %3 : vector<1x16x288xf32> to vector<16x288xf32>
    %5 = arith.truncf %4 : vector<16x288xf32> to vector<16x288xbf16>
    %6 = vector.extract_strided_slice %5 {offsets = [0, 0], sizes = [16, 258], strides = [1, 1]} : vector<16x288xbf16> to vector<16x258xbf16>
    %7 = vector.extract_strided_slice %5 {offsets = [0, 1], sizes = [16, 258], strides = [1, 1]} : vector<16x288xbf16> to vector<16x258xbf16>
    %8 = vector.extract_strided_slice %5 {offsets = [0, 2], sizes = [16, 258], strides = [1, 1]} : vector<16x288xbf16> to vector<16x258xbf16>
    %9 = vector.extract_strided_slice %5 {offsets = [0, 3], sizes = [16, 258], strides = [1, 1]} : vector<16x288xbf16> to vector<16x258xbf16>
    %10 = vector.extract_strided_slice %5 {offsets = [0, 4], sizes = [16, 258], strides = [1, 1]} : vector<16x288xbf16> to vector<16x258xbf16>
    %11 = vector.extract_strided_slice %5 {offsets = [0, 5], sizes = [16, 258], strides = [1, 1]} : vector<16x288xbf16> to vector<16x258xbf16>
    %12 = vector.extract_strided_slice %5 {offsets = [0, 6], sizes = [16, 258], strides = [1, 1]} : vector<16x288xbf16> to vector<16x258xbf16>
    %13 = vector.extract_strided_slice %5 {offsets = [0, 7], sizes = [16, 258], strides = [1, 1]} : vector<16x288xbf16> to vector<16x258xbf16>
    %14 = vector.extract_strided_slice %5 {offsets = [0, 8], sizes = [16, 258], strides = [1, 1]} : vector<16x288xbf16> to vector<16x258xbf16>
    %15 = vector.extract_strided_slice %5 {offsets = [0, 9], sizes = [16, 258], strides = [1, 1]} : vector<16x288xbf16> to vector<16x258xbf16>
    %16 = vector.extract_strided_slice %5 {offsets = [0, 10], sizes = [16, 258], strides = [1, 1]} : vector<16x288xbf16> to vector<16x258xbf16>
    %17 = vector.extract_strided_slice %5 {offsets = [0, 11], sizes = [16, 258], strides = [1, 1]} : vector<16x288xbf16> to vector<16x258xbf16>
    %18 = vector.extract_strided_slice %5 {offsets = [0, 12], sizes = [16, 258], strides = [1, 1]} : vector<16x288xbf16> to vector<16x258xbf16>
    %19 = vector.extract_strided_slice %5 {offsets = [0, 13], sizes = [16, 258], strides = [1, 1]} : vector<16x288xbf16> to vector<16x258xbf16>
    %20 = vector.extract_strided_slice %5 {offsets = [0, 14], sizes = [16, 258], strides = [1, 1]} : vector<16x288xbf16> to vector<16x258xbf16>
    %21 = vector.extract_strided_slice %5 {offsets = [0, 15], sizes = [16, 258], strides = [1, 1]} : vector<16x288xbf16> to vector<16x258xbf16>
    %22 = vector.extract_strided_slice %5 {offsets = [0, 16], sizes = [16, 258], strides = [1, 1]} : vector<16x288xbf16> to vector<16x258xbf16>
    %23 = vector.extract_strided_slice %5 {offsets = [0, 17], sizes = [16, 258], strides = [1, 1]} : vector<16x288xbf16> to vector<16x258xbf16>
    %24 = vector.extract_strided_slice %5 {offsets = [0, 18], sizes = [16, 258], strides = [1, 1]} : vector<16x288xbf16> to vector<16x258xbf16>
    %25 = vector.extract_strided_slice %5 {offsets = [0, 19], sizes = [16, 258], strides = [1, 1]} : vector<16x288xbf16> to vector<16x258xbf16>
    %26 = vector.extract_strided_slice %5 {offsets = [0, 20], sizes = [16, 258], strides = [1, 1]} : vector<16x288xbf16> to vector<16x258xbf16>
    %27 = vector.extract_strided_slice %5 {offsets = [0, 21], sizes = [16, 258], strides = [1, 1]} : vector<16x288xbf16> to vector<16x258xbf16>
    %28 = vector.extract_strided_slice %5 {offsets = [0, 22], sizes = [16, 258], strides = [1, 1]} : vector<16x288xbf16> to vector<16x258xbf16>
    %29 = vector.extract_strided_slice %5 {offsets = [0, 23], sizes = [16, 258], strides = [1, 1]} : vector<16x288xbf16> to vector<16x258xbf16>
    %30 = vector.extract_strided_slice %5 {offsets = [0, 24], sizes = [16, 258], strides = [1, 1]} : vector<16x288xbf16> to vector<16x258xbf16>
    %31 = vector.extract_strided_slice %5 {offsets = [0, 25], sizes = [16, 258], strides = [1, 1]} : vector<16x288xbf16> to vector<16x258xbf16>
    %32 = vector.extract_strided_slice %5 {offsets = [0, 26], sizes = [16, 258], strides = [1, 1]} : vector<16x288xbf16> to vector<16x258xbf16>
    %33 = vector.extract_strided_slice %5 {offsets = [0, 27], sizes = [16, 258], strides = [1, 1]} : vector<16x288xbf16> to vector<16x258xbf16>
    %34 = vector.extract_strided_slice %5 {offsets = [0, 28], sizes = [16, 258], strides = [1, 1]} : vector<16x288xbf16> to vector<16x258xbf16>
    %35 = vector.extract_strided_slice %5 {offsets = [0, 29], sizes = [16, 258], strides = [1, 1]} : vector<16x288xbf16> to vector<16x258xbf16>
    %36 = vector.extract_strided_slice %5 {offsets = [0, 30], sizes = [16, 258], strides = [1, 1]} : vector<16x288xbf16> to vector<16x258xbf16>
    %37 = tpu.concatenate %6, %7, %8, %9, %10, %11, %12, %13, %14, %15, %16, %17, %18, %19, %20, %21 in 0 : vector<16x258xbf16>, vector<16x258xbf16>, vector<16x258xbf16>, vector<16x258xbf16>, vector<16x258xbf16>, vector<16x258xbf16>, vector<16x258xbf16>, vector<16x258xbf16>, vector<16x258xbf16>, vector<16x258xbf16>, vector<16x258xbf16>, vector<16x258xbf16>, vector<16x258xbf16>, vector<16x258xbf16>, vector<16x258xbf16>, vector<16x258xbf16> -> vector<256x258xbf16>
    %38 = tpu.concatenate %22, %23, %24, %25, %26, %27, %28, %29, %30, %31, %32, %33, %34, %35, %36 in 0 : vector<16x258xbf16>, vector<16x258xbf16>, vector<16x258xbf16>, vector<16x258xbf16>, vector<16x258xbf16>, vector<16x258xbf16>, vector<16x258xbf16>, vector<16x258xbf16>, vector<16x258xbf16>, vector<16x258xbf16>, vector<16x258xbf16>, vector<16x258xbf16>, vector<16x258xbf16>, vector<16x258xbf16>, vector<16x258xbf16> -> vector<240x258xbf16>
    %39 = tpu.concatenate %37, %38 in 0 : vector<256x258xbf16>, vector<240x258xbf16> -> vector<496x258xbf16>
    %c0_1 = arith.constant 0 : index
    %c0_2 = arith.constant 0 : index
    %40 = vector.load %arg3[%c0_1, %c0_2] : memref<16x496xbf16, #tpu.memory_space<vmem>>, vector<16x496xbf16>
    %cst = arith.constant dense<0.000000e+00> : vector<16x258xf32>
    %41 = tpu.matmul %40, %39, %cst {dimension_numbers = #tpu.dot_dimension_numbers<[1], [0], [0], [1], [0, 0, 1, 1], [], []>} : vector<16x496xbf16>, vector<496x258xbf16>, vector<16x258xf32> -> vector<16x258xf32>
    %c0_3 = arith.constant 0 : index
    %c0_4 = arith.constant 0 : index
    %42 = vector.load %arg4[%c0_3, %c0_4] : memref<16x1xf32, #tpu.memory_space<vmem>>, vector<16x1xf32>
    %43 = vector.broadcast %42 : vector<16x1xf32> to vector<16x258xf32>
    %44 = arith.addf %41, %43 : vector<16x258xf32>
    %cst_5 = arith.constant 0.000000e+00 : f32
    %45 = vector.broadcast %cst_5 : f32 to vector<16x258xf32>
    %46 = arith.maximumf %44, %45 : vector<16x258xf32>
    %c1_i32 = arith.constant 1 : i32
    %47 = arith.subi %1, %c1_i32 : i32
    %48 = tpu.iota {dimensions = array<i32: 1>} : vector<1x258xi32>
    %49 = vector.broadcast %47 : i32 to vector<1x258xi32>
    %50 = arith.addi %49, %48 : vector<1x258xi32>
    %c0_i32 = arith.constant 0 : i32
    %51 = vector.broadcast %c0_i32 : i32 to vector<1x258xi32>
    %52 = arith.cmpi sge, %50, %51 : vector<1x258xi32>
    %c1024_i32 = arith.constant 1024 : i32
    %53 = vector.broadcast %c1024_i32 : i32 to vector<1x258xi32>
    %54 = arith.cmpi slt, %50, %53 : vector<1x258xi32>
    %55 = arith.andi %52, %54 : vector<1x258xi1>
    %cst_6 = arith.constant 0.000000e+00 : f32
    %56 = vector.shape_cast %55 : vector<1x258xi1> to vector<1x258xi1>
    %57 = vector.broadcast %56 : vector<1x258xi1> to vector<16x258xi1>
    %58 = vector.broadcast %cst_6 : f32 to vector<16x258xf32>
    %59 = arith.select %57, %46, %58 : vector<16x258xi1>, vector<16x258xf32>
    %60 = arith.truncf %59 : vector<16x258xf32> to vector<16x258xbf16>
    %61 = vector.extract_strided_slice %60 {offsets = [0, 0], sizes = [16, 256], strides = [1, 1]} : vector<16x258xbf16> to vector<16x256xbf16>
    %62 = vector.extract_strided_slice %60 {offsets = [0, 1], sizes = [16, 256], strides = [1, 1]} : vector<16x258xbf16> to vector<16x256xbf16>
    %63 = vector.extract_strided_slice %60 {offsets = [0, 2], sizes = [16, 256], strides = [1, 1]} : vector<16x258xbf16> to vector<16x256xbf16>
    %64 = tpu.concatenate %61, %62, %63 in 0 : vector<16x256xbf16>, vector<16x256xbf16>, vector<16x256xbf16> -> vector<48x256xbf16>
    %c0_7 = arith.constant 0 : index
    %c0_8 = arith.constant 0 : index
    %65 = vector.load %arg5[%c0_7, %c0_8] : memref<16x48xbf16, #tpu.memory_space<vmem>>, vector<16x48xbf16>
    %cst_9 = arith.constant dense<0.000000e+00> : vector<16x256xf32>
    %66 = tpu.matmul %65, %64, %cst_9 {dimension_numbers = #tpu.dot_dimension_numbers<[1], [0], [0], [1], [0, 0, 1, 1], [], []>} : vector<16x48xbf16>, vector<48x256xbf16>, vector<16x256xf32> -> vector<16x256xf32>
    %c0_10 = arith.constant 0 : index
    %c0_11 = arith.constant 0 : index
    %67 = vector.load %arg6[%c0_10, %c0_11] : memref<16x1xf32, #tpu.memory_space<vmem>>, vector<16x1xf32>
    %68 = vector.broadcast %67 : vector<16x1xf32> to vector<16x256xf32>
    %69 = arith.addf %66, %68 : vector<16x256xf32>
    %cst_12 = arith.constant 0.000000e+00 : f32
    %70 = vector.broadcast %cst_12 : f32 to vector<16x256xf32>
    %71 = arith.maximumf %69, %70 : vector<16x256xf32>
    %72 = vector.extract_strided_slice %4 {offsets = [0, 16], sizes = [16, 256], strides = [1, 1]} : vector<16x288xf32> to vector<16x256xf32>
    %73 = arith.addf %71, %72 : vector<16x256xf32>
    %c0_13 = arith.constant 0 : index
    %c0_14 = arith.constant 0 : index
    %c0_15 = arith.constant 0 : index
    %74 = vector.load %arg7[%c0_13, %c0_14, %c0_15] : memref<1x16x256xf32, #tpu.memory_space<vmem>>, vector<1x16x256xf32>
    %75 = vector.shape_cast %74 : vector<1x16x256xf32> to vector<16x256xf32>
    %76 = vector.shape_cast %73 : vector<16x256xf32> to vector<1x16x256xf32>
    tpu.vector_store %arg7[%c0_13, %c0_14, %c0_15], %76 {strides = array<i32>} : memref<1x16x256xf32, #tpu.memory_space<vmem>>, vector<1x16x256xf32>,
    return
  }
  func.func @transform_0(%arg0: i32, %arg1: i32) -> (i32, i32, i32) {
    %c0_i32 = arith.constant 0 : i32
    %c0_i32_0 = arith.constant 0 : i32
    %c0_i32_1 = arith.constant 0 : i32
    return %arg0, %c0_i32, %c0_i32_0 : i32, i32, i32
  }
  func.func @transform_1(%arg0: i32, %arg1: i32) -> (i32, i32) {
    %c0_i32 = arith.constant 0 : i32
    %c0_i32_0 = arith.constant 0 : i32
    %c0_i32_1 = arith.constant 0 : i32
    return %c0_i32, %c0_i32_0 : i32, i32
  }
  func.func @transform_2(%arg0: i32, %arg1: i32) -> (i32, i32) {
    %c0_i32 = arith.constant 0 : i32
    %c0_i32_0 = arith.constant 0 : i32
    %c0_i32_1 = arith.constant 0 : i32
    return %c0_i32, %c0_i32_0 : i32, i32
  }
  func.func @transform_3(%arg0: i32, %arg1: i32) -> (i32, i32) {
    %c0_i32 = arith.constant 0 : i32
    %c0_i32_0 = arith.constant 0 : i32
    %c0_i32_1 = arith.constant 0 : i32
    return %c0_i32, %c0_i32_0 : i32, i32
  }
  func.func @transform_4(%arg0: i32, %arg1: i32) -> (i32, i32) {
    %c0_i32 = arith.constant 0 : i32
    %c0_i32_0 = arith.constant 0 : i32
    %c0_i32_1 = arith.constant 0 : i32
    return %c0_i32, %c0_i32_0 : i32, i32
  }
  func.func @transform_5(%arg0: i32, %arg1: i32) -> (i32, i32, i32) {
    %c0_i32 = arith.constant 0 : i32
    %c0_i32_0 = arith.constant 0 : i32
    return %arg0, %c0_i32, %arg1 : i32, i32, i32
  }
}

</mosaic_0001>

<bundles_post_ra>
// kernel: tpu_custom_call.1
= control target key start
LH: loop header
LB: loop body
LE: loop exit
PB: predicated region body
PF: predicated region fallthrough
CT: control target
= control target key end

     0   :  { %s2128_s0 = inlined_call_operand.hbm [shape: f32[2,16,1056], index: 0, kind: input, shape index: {}]   ;;  %s2129_s1 = inlined_call_operand.vmem [shape: bf16[16,496], index: 1, kind: input, shape index: {}]   ;;  %s2130_s2 = inlined_call_operand.vmem [shape: f32[16,1], index: 2, kind: input, shape index: {}]   ;;  %s2131_s3 = inlined_call_operand.hbm [shape: bf16[16,48], index: 3, kind: input, shape index: {}]   ;;  %s2132_s4 = inlined_call_operand.vmem [shape: f32[16,1], index: 4, kind: input, shape index: {}]   ;;  %s2133_s5 = inlined_call_operand.hbm [shape: f32[2,16,1024], index: 5, kind: output, shape index: {}]  }
   0x1   :  { %2143 = sst [smem:[#allocation18_spill]] %s2131_s3 }
   0x2   :  { %2144 = sst [smem:[#allocation19_spill]] %s2133_s5 }
   0x3   :  { %10 = vsyncpa [#allocation3], 0 }
   0x4   :  { %12 = vsyncpa [#allocation3 + $0x1], 0 }
   0x5   :  { %13 = vsyncpa [#allocation6], 0 }
   0x6   :  { %14 = vsyncpa [#allocation4], 0 }
   0x7   :  { %16 = vsyncpa [#allocation4 + $0x1], 0  ;;  %s1565_s18 = smov 0   ;;  %s1567_s19 = smov 0  }
   0x8   :  { %s1569_s20 = smov 0   ;;  %s1571_s21 = smov 0  }
   0x9   :  { %s1573_s22 = smov 0   ;;  %s1575_s23 = smov 0  }
   0xa   :  { %s1577_s24 = smov 0   ;;  %s1579_s25 = smov 0  }
   0xb   :  { %s1581_s26 = smov 0   ;;  %s1583_s27 = smov 0  }
   0xc   :  { %s1585_s28 = smov 0  }
   0xd LB: > { %2145 = sst [smem:[#allocation11_spill]] %s1466_s18  ;;  %s1125_s29 = sadd.s32 4294967295, %s1506_s28   ;;  %s1506_s28 = sphi %s1585_s28, %s22_s28   ;;  %s1502_s27 = sphi %s1583_s27, %s2183_s27   ;;  %s1498_s26 = sphi %s1581_s26, %s2182_s26   ;;  %s1494_s25 = sphi %s1579_s25, %s2181_s25   ;;  %s1490_s24 = sphi %s1577_s24, %s2172_s24   ;;  %s1486_s23 = sphi %s1575_s23, %s2180_s23   ;;  %s1482_s22 = sphi %s1573_s22, %s2179_s22   ;;  %s1478_s21 = sphi %s1571_s21, %s2178_s21   ;;  %s1474_s20 = sphi %s1569_s20, %s2177_s20   ;;  %s1470_s19 = sphi %s1567_s19, %s2176_s19   ;;  %s1466_s18 = sphi %s1565_s18, %s2175_s18  }
   0xe   : > { %2146 = sst [smem:[#allocation12_spill]] %s1494_s25  ;;  %s1126_s30 = sadd.s32 4294967294, %s1506_s28  }
   0xf   : > { %2147 = sst [smem:[#allocation13_spill]] %s1498_s26  ;;  %p54_p0 = scmp.ne.s32.totalorder %s1482_s22, %s1478_s21 }
  0x10   : > { %p1621_p1 = scmp.eq.s32.totalorder %s1125_s29, 0  ;;  %p163_p2 = scmp.ne.s32.totalorder %s1474_s20, %s1470_s19 }
  0x11   : > { %p164_p4 = scmp.eq.s32.totalorder %s1125_s29, 7  ;;  %p169_p5 = scmp.ne.s32.totalorder %s1470_s19, %s1466_s18 }
  0x12   : > { %p1630_p3 = por %p1621_p1, %p54_p0  ;;  %p170_p6 = scmp.eq.s32.totalorder %s1126_s30, 7 }
  0x13   : > { %p1636_p7 = por %p164_p4, %p163_p2  ;;  %p1127_p8 = scmp.ge.s32.totalorder %s1506_s28, 1 }
  0x14   : > { %p1641_p9 = por %p170_p6, %p169_p5  ;;  %p177_p10 = scmp.lt.s32.totalorder %s1506_s28, 9 }
  0x15   : > { %s2150_s9 = scalar_select %p1636_p7, 1, 0 }
  0x16   : > { %s2152_s10 = scalar_select %p1641_p9, 1, 0 }
  0x17   : > { %2151 = sst [smem:[#allocation14_spill]] %s2150_s9  ;;  %p1646_p11 = pnand %p1127_p8, %p177_p10 }
  0x18   : > { %2153 = sst [smem:[#allocation15_spill]] %s2152_s10  ;;  %s1508_s12 = smov [#allocation5]  }
  0x19   : > { %s195_s13 = sshll.u32 %s1508_s12, 4  ;;  %p1190_p12 = pneg %p1646_p11  ;;  %s196_s13 = int_to_ptr.vmem [resolvable:$true] %s195_s13 }
  0x1a   : > { %s1339_s14 = scalar_lea.vmem %s196_s13, 128  ;;  %p1347_p6 = scmp.lt.s32.totalorder %s196_s13, %s196_s13 }
  0x1b   : > { %p1191_p13 = pnand %p1190_p12, %p1621_p1  ;;  %p1340_p2 = scmp.ne.s32.totalorder %s196_s13, %s1339_s14 }
  0x1c   : > { %p1348_p9 = scmp.lt.s32.totalorder %s1339_s14, %s1339_s14 }
  0x1d   : > { %p1330_p0 = pneg %p1191_p13 }
  0x1e   : > { %p1349_p7 = por %p1348_p9, %p1347_p6 }
  0x1f   : > { %p1342_p4 = pnand %p1340_p2, %p1330_p0 }
  0x21   : > { %p1343_p5 = pneg %p1342_p4 }
  0x23   : > { %p1350_p8 = pnand %p1349_p7, %p1343_p5 }
  0x25   : > { %1353 = shalt.err (!%p1350_p8)
}
  0x26   : > { %s1509_s15 = smov 64   ;;  %s1510_s16 = smov 4  }
  0x27   : > { %s2155_s3 = sld [smem:[#allocation18_spill]]  ;;  %s31_s29 = sadd.s32 1, %s1498_s26 }
  0x28   : > { %p32_p7 = scmp.ge.s32.totalorder %s31_s29, 4  ;;  %s34_s30 = sadd.s32 1, %s1502_s27 }
  0x29   : > { %s41_s12 = sadd.s32 1, %s1486_s23  ;;  %p48_p9 = scmp.ne.s32.totalorder %s1486_s23, %s1482_s22 }
  0x2a   : > { %s2185_s29 = smov (%p32_p7, %s31_s29), 0  ;;  %s2187_s30 = smov (!%p32_p7, %s34_s30), %s1502_s27 }
  0x2b   : > { %2156 = sst [smem:[#allocation16_spill]] %s2185_s29  ;;  %p49_p10 = scmp.eq.s32.totalorder %s1506_s28, 0 }
  0x2c   : > { %s149_s14 = ssub.s32 %s1498_s26, %s2185_s29  ;;  %p36_p12 = scmp.ge.s32.totalorder %s2187_s30, 2 }
  0x2d   : > { %1193 = dma.hbm_to_vmem [thread:$0]  (!%p1191_p13), %s2155_s3, 128, %s196_s13, [#allocation6], %s1509_s15, %s1509_s15, %s1510_s16  }
  0x2e   : > { %p1203_p0 = scmp.lt.s32.totalorder %s1506_s28, 8  ;;  %p1669_p13 = por %p49_p10, %p48_p9 }
  0x2f   : > { %s212_s15 = sand.u32 1, %s1486_s23   ;;  %s2189_s30 = smov (%p36_p12, %s2187_s30), 0 }
  0x30   : > { %2158 = sst [smem:[#allocation17_spill]] %s2189_s30  ;;  %s1179_s16 = smul.u32 144, %s212_s15 }
  0x31   : > { %s38_s17 = ssub.s32 %s1502_s27, %s2189_s30  ;;  %s1180_s21 = smul.u32 2304, %s1502_s27 }
  0x32   : > { %p39_p2 = scmp.eq.s32.totalorder %s38_s17, 0  ;;  %s150_s7 = sor.u32 %s149_s14, %s38_s17 }
  0x33   : > { %p151_p4 = scmp.eq.s32.totalorder %s150_s7, 0  ;;  %s2159_s29 = sadd.s32 1, %s1474_s20 }
  0x34   : > { %s1680_s3 = scalar_select %p39_p2, %s1486_s23, %s41_s12  }
  0x35   : > { %s1685_s26 = scalar_select %p151_p4, %s1474_s20, %s2159_s29  }
  0x36   : > { %s222_s5 = scalar_lea.hbm %s2128_s0, %s1180_s21  ;;  %s216_s9 = scalar_lea.vmem [#allocation2], %s1179_s16 }
  0x37   : > { %s223_s25 = sshll.u32 %s216_s9, 4  ;;  %p1694_p5 = pnand %p1203_p0, %p1669_p13  ;;  %s224_s25 = int_to_ptr.vmem [resolvable:$true] %s223_s25 }
  0x38   : > { %s213_s7 = scalar_lea.sflag [#allocation3], %s212_s15  ;;  %s1367_s12 = scalar_lea.vmem %s224_s25, 2304 }
  0x39   : > { %p1356_p6 = pneg %p1694_p5  ;;  %p1368_p8 = scmp.ne.s32.totalorder %s224_s25, %s1367_s12 }
  0x3a   : > { %s1511_s29 = smov [#allocation2]  }
  0x3b   : > { %p1370_p7 = pnand %p1368_p8, %p1356_p6  ;;  %s1372_s18 = sshll.u32 %s1511_s29, 4  ;;  %s1373_s18 = int_to_ptr.vmem [resolvable:$false] %s1372_s18 }
  0x3c   : > { %s1374_s10 = scalar_lea.vmem %s1373_s18, 4608  ;;  %p1375_p10 = scmp.lt.s32.totalorder %s224_s25, %s1373_s18 }
  0x3d   : > { %p1371_p9 = pneg %p1370_p7  ;;  %p1376_p12 = scmp.lt.s32.totalorder %s1374_s10, %s1367_s12 }
  0x3f   : > { %p1377_p2 = por %p1376_p12, %p1375_p10 }
  0x41   : > { %p1378_p4 = pnand %p1377_p2, %p1371_p9 }
  0x43   : > { %1381 = shalt.err (!%p1378_p4)
}
  0x44   : > { %s1512_s9 = smov 1152   ;;  %s1513_s14 = smov 72  }
  0x45   : > { %1197 = dma.hbm_to_vmem [thread:$0]  (!%p1694_p5), %s222_s5, 2304, %s224_s25, %s213_s7, %s1512_s9, %s1512_s9, %s1513_s14  }
  0x46   : > { %235 = sbr.rel (%p1646_p11) target bundleno = 1024 (0x400), region = 40  ;;  %s237_s13 = sand.u32 (!%p1646_p11), 1, %s1482_s22  }
  0x47   : > { %s1181_s15 = smul.u32 (!%p1646_p11), 144, %s237_s13  ;;  %s238_s16 = scalar_lea.sflag (!%p1646_p11), [#allocation3], %s237_s13 }
  0x49   : > { %s241_s17 = scalar_lea.vmem (!%p1646_p11), [#allocation2], %s1181_s15 }
  0x4b   : > { %1453 = dma.done.wait (%p1630_p3), %s238_s16, 2304  }
  0x4c   : > { %1455 = vsyncadd (%p1630_p3), %s238_s16, 4294964992 }
  0x4d   : > { %1457 = dma.done.wait (%p1621_p1), [#allocation6], 128  }
  0x4e   : > { %1459 = vsyncadd (%p1621_p1), [#allocation6], 4294967168  ;;  %s1134_s5 = sshll.u32 %s1490_s24, 8  ;;  %s1514_s6 = smov 121   ;;  %v1794_v9 = vld [vmem:[%s2129_s1 + $0x4] ss:$16 sps:$4 sm:$0xff]  }
  0x4f   : > { %s275_s25 = sshra.s32 %s1134_s5, 7  ;;  %s1515_s8 = smov 122   ;;  %v1529_v10 = vmov 0   ;;  %708 = vmatprep.mubr.bf16.mxu0 %v1794_v9  ;;  %vm369_vm0 = vcmask 990208   ;;  %vm357_vm1 = vcmask 998400   ;;  %vm345_vm2 = vcmask 1006592  }
  0x50   : > { %s1135_s11 = sshll.u32 %s275_s25, 3  ;;  %s1516_s21 = smov 123   ;;  %1320 = vset.pattern.permute.xlu1 %v1529_v10  ;;  %1319 = vset.pattern.permute.xlu0 %v1529_v10  ;;  %vm333_vm3 = vcmask 1014784   ;;  %vm321_vm4 = vcmask 1022976   ;;  %vm309_vm5 = vcmask 1031168   ;;  %vm297_vm6 = vcmask 1039360  }
  0x51   : > { %s278_s30 = scalar_lea.vmem %s241_s17, %s1135_s11 [#allocation2]  ;;  %s1517_s7 = smov 124   ;;  %vm441_vm7 = vcmask 941056   ;;  %vm453_vm8 = vcmask 932864   ;;  %vm417_vm9 = vcmask 957440   ;;  %vm429_vm10 = vcmask 949248  }
  0x52   : > { %v1716_v0 = vld [vmem:[%s278_s30 + $0x8] sm:$0xff]  ;;  %v1718_v1 = vld [vmem:[%s278_s30 + $0x50] sm:$0xff]  ;;  %v1720_v2 = vld [vmem:[%s278_s30] sm:$0xff]  ;;  %s1518_s12 = smov 125   ;;  %s1519_s29 = smov 126   ;;  %vm465_vm11 = vcmask 924672  }
  0x53   : > { %v1724_v3 = vpack.c.bf16 %v1718_v1, %v1716_v0  ;;  %v1726_v4 = vld [vmem:[%s278_s30 + $0x48] sm:$0xff]  ;;  %v1728_v5 = vld [vmem:[%s278_s30 + $0x10] sm:$0xff]  ;;  %v1730_v6 = vld [vmem:[%s278_s30 + $0x58] sm:$0xff]  ;;  %s1520_s18 = smov 127   ;;  %s1521_s10 = smov 114   ;;  %vm393_vm12 = vcmask 973824  }
  0x54   : > { %v1734_v7 = vpack.c.bf16 %v1726_v4, %v1720_v2  ;;  %v1739_v8 = vpack.c.bf16 %v1730_v6, %v1728_v5  ;;  %s1522_s9 = smov 115   ;;  %s1523_s14 = smov 116   ;;  %vm405_vm13 = vcmask 965632   ;;  %vm381_vm14 = vcmask 982016  }
  0x55   : > { %365 = vrot.lane.b32.xlu0 %v1724_v3, %s1514_s6  ;;  %s1524_s13 = smov 117   ;;  %s1525_s15 = smov 118   ;;  %vm561_vm15 = vcmask 916480  }
  0x56   : > { %363 = vrot.lane.b32.xlu1 %v1734_v7, %s1514_s6  ;;  %s1526_s16 = smov 119   ;;  %s1527_s17 = smov 120  }
  0x57   : > { %s1528_s25 = smov 113  }
  0x59   : > { %367 = vrot.lane.b32.xlu0 %v1739_v8, %s1514_s6  ;;  %s1530_s6 = smov 112  }
  0x5a   : > { %353 = vrot.lane.b32.xlu1 %v1724_v3, %s1515_s8 }
  0x5d   : > { %355 = vrot.lane.b32.xlu0 %v1739_v8, %s1515_s8 }
  0x5e   : > { %351 = vrot.lane.b32.xlu1 %v1734_v7, %s1515_s8  ;;  %s1152_s8 = sshll.u32 %s1490_s24, 1  ;;  %s2166_s24 = sld [smem:[#allocation14_spill]] }
  0x61   : > { %341 = vrot.lane.b32.xlu0 %v1724_v3, %s1516_s21 }
  0x62   : > { %343 = vrot.lane.b32.xlu1 %v1739_v8, %s1516_s21 }
  0x64   : > { %p2168_p3 = scmp.ne.s32.totalorder %s2166_s24, 0 }
  0x65   : > { %339 = vrot.lane.b32.xlu0 %v1734_v7, %s1516_s21 }
  0x66   : > { %329 = vrot.lane.b32.xlu1 %v1724_v3, %s1517_s7 }
  0x69   : > { %331 = vrot.lane.b32.xlu0 %v1739_v8, %s1517_s7 }
  0x6a   : > { %327 = vrot.lane.b32.xlu1 %v1734_v7, %s1517_s7 }
  0x6d   : > { %317 = vrot.lane.b32.xlu0 %v1724_v3, %s1518_s12 }
  0x6e   : > { %319 = vrot.lane.b32.xlu1 %v1739_v8, %s1518_s12 }
  0x71   : > { %315 = vrot.lane.b32.xlu0 %v1734_v7, %s1518_s12 }
  0x72   : > { %305 = vrot.lane.b32.xlu1 %v1724_v3, %s1519_s29 }
  0x75   : > { %307 = vrot.lane.b32.xlu0 %v1739_v8, %s1519_s29 }
  0x76   : > { %303 = vrot.lane.b32.xlu1 %v1734_v7, %s1519_s29 }
  0x79   : > { %293 = vrot.lane.b32.xlu0 %v1724_v3, %s1520_s18 }
  0x7a   : > { %295 = vrot.lane.b32.xlu1 %v1739_v8, %s1520_s18 }
  0x7d   : > { %291 = vrot.lane.b32.xlu0 %v1734_v7, %s1520_s18 }
  0x7e   : > { %449 = vrot.lane.b32.xlu1 %v1724_v3, %s1521_s10 }
  0x81   : > { %451 = vrot.lane.b32.xlu0 %v1739_v8, %s1521_s10 }
  0x82   : > { %447 = vrot.lane.b32.xlu1 %v1734_v7, %s1521_s10 }
  0x85   : > { %437 = vrot.lane.b32.xlu0 %v1724_v3, %s1522_s9 }
  0x86   : > { %439 = vrot.lane.b32.xlu1 %v1739_v8, %s1522_s9 }
  0x89   : > { %435 = vrot.lane.b32.xlu0 %v1734_v7, %s1522_s9 }
  0x8a   : > { %425 = vrot.lane.b32.xlu1 %v1724_v3, %s1523_s14 }
  0x8d   : > { %427 = vrot.lane.b32.xlu0 %v1739_v8, %s1523_s14 }
  0x8e   : > { %423 = vrot.lane.b32.xlu1 %v1734_v7, %s1523_s14 }
  0x91   : > { %413 = vrot.lane.b32.xlu0 %v1724_v3, %s1524_s13 }
  0x92   : > { %415 = vrot.lane.b32.xlu1 %v1739_v8, %s1524_s13 }
  0x95   : > { %411 = vrot.lane.b32.xlu0 %v1734_v7, %s1524_s13 }
  0x96   : > { %401 = vrot.lane.b32.xlu1 %v1724_v3, %s1525_s15 }
  0x99   : > { %403 = vrot.lane.b32.xlu0 %v1739_v8, %s1525_s15 }
  0x9a   : > { %399 = vrot.lane.b32.xlu1 %v1734_v7, %s1525_s15  ;;  %s2167_s15 = sld [smem:[#allocation19_spill]] }
  0x9d   : > { %389 = vrot.lane.b32.xlu0 %v1724_v3, %s1526_s16 }
  0x9e   : > { %391 = vrot.lane.b32.xlu1 %v1739_v8, %s1526_s16 }
  0xa1   : > { %387 = vrot.lane.b32.xlu0 %v1734_v7, %s1526_s16 }
  0xa2   : > { %377 = vrot.lane.b32.xlu1 %v1724_v3, %s1527_s17 }
  0xa5   : > { %379 = vrot.lane.b32.xlu0 %v1739_v8, %s1527_s17 }
  0xa6   : > { %375 = vrot.lane.b32.xlu1 %v1734_v7, %s1527_s17  ;;  %s1142_s17 = sadd.s32 4294967295, %s1134_s5 }
  0xa9   : > { %461 = vrot.lane.b32.xlu0 %v1724_v3, %s1528_s25 }
  0xaa   : > { %463 = vrot.lane.b32.xlu1 %v1739_v8, %s1528_s25 }
  0xad   : > { %459 = vrot.lane.b32.xlu0 %v1734_v7, %s1528_s25  ;;  %s1531_s25 = smov [#allocation7]  }
  0xae   : > { %s1386_s11 = sshll.u32 %s1531_s25, 4  ;;  %s1387_s11 = int_to_ptr.vmem [resolvable:$false] %s1386_s11 }
  0xaf   : > { %s1388_s30 = scalar_lea.vmem %s1387_s11, 1024 }
  0xc7   : > { %v366_v11 = vpop.permute.xlu0 %365 }
  0xc8   : > { %v364_v12 = vpop.permute.xlu1 %363 }
  0xc9   : > { %v370_v16 = vsel %vm369_vm0, %v364_v12, %v366_v11 }
  0xcb   : > { %v1799_v13 = vpop.permute.xlu0 %367 }
  0xcc   : > { %v354_v14 = vpop.permute.xlu1 %353  ;;  %517 = vrot.lane.b32.xlu1 %v1799_v13, %s1530_s6  ;;  %v371_v15 = vsel %vm369_vm0, %v366_v11, %v1799_v13 }
  0xcd   : > { %676 = vmatprep.subr.bf16.mxu0 %v371_v15 }
  0xce   : > { %677 = vmatpush1.bf16.msra.mxu0 %v370_v16 }
  0xcf   : > { %v1804_v17 = vpop.permute.xlu0 %355 }
  0xd0   : > { %v352_v18 = vpop.permute.xlu1 %351  ;;  %511 = vrot.lane.b32.xlu0 %v1804_v17, %s1530_s6  ;;  %v359_v19 = vsel %vm357_vm1, %v354_v14, %v1804_v17 }
  0xd1   : > { %678 = vmatprep.subr.bf16.mxu0 %v359_v19  ;;  %v358_v20 = vsel %vm357_vm1, %v352_v18, %v354_v14 }
  0xd2   : > { %679 = vmatpush1.bf16.msra.mxu0 %v358_v20 }
  0xd3   : > { %v342_v21 = vpop.permute.xlu0 %341 }
  0xd4   : > { %v1809_v22 = vpop.permute.xlu1 %343 }
  0xd5   : > { %v347_v23 = vsel %vm345_vm2, %v342_v21, %v1809_v22  ;;  %505 = vrot.lane.b32.xlu0 %v1809_v22, %s1530_s6 }
  0xd6   : > { %680 = vmatprep.subr.bf16.mxu0 %v347_v23 }
  0xd7   : > { %v340_v24 = vpop.permute.xlu0 %339 }
  0xd8   : > { %v330_v25 = vpop.permute.xlu1 %329  ;;  %v346_v26 = vsel %vm345_vm2, %v340_v24, %v342_v21 }
  0xd9   : > { %681 = vmatpush1.bf16.msra.mxu0 %v346_v26 }
  0xdb   : > { %v1814_v27 = vpop.permute.xlu0 %331 }
  0xdc   : > { %v328_v28 = vpop.permute.xlu1 %327  ;;  %499 = vrot.lane.b32.xlu1 %v1814_v27, %s1530_s6  ;;  %v335_v29 = vsel %vm333_vm3, %v330_v25, %v1814_v27 }
  0xdd   : > { %682 = vmatprep.subr.bf16.mxu0 %v335_v29  ;;  %v334_v30 = vsel %vm333_vm3, %v328_v28, %v330_v25 }
  0xde   : > { %683 = vmatpush1.bf16.msra.mxu0 %v334_v30 }
  0xdf   : > { %v318_v31 = vpop.permute.xlu0 %317 }
  0xe0   : > { %v1819_v32 = vpop.permute.xlu1 %319 }
  0xe1   : > { %493 = vrot.lane.b32.xlu0 %v1819_v32, %s1530_s6  ;;  %v323_v33 = vsel %vm321_vm4, %v318_v31, %v1819_v32 }
  0xe2   : > { %684 = vmatprep.subr.bf16.mxu0 %v323_v33 }
  0xe3   : > { %v316_v34 = vpop.permute.xlu0 %315 }
  0xe4   : > { %v322_v35 = vsel %vm321_vm4, %v316_v34, %v318_v31  ;;  %v306_v36 = vpop.permute.xlu1 %305  ;;  %v1326_v34 = vld [vmem:[%s2129_s1 + $0xc] ss:$16 sps:$4 sm:$0xff]  }
  0xe5   : > { %515 = vrot.lane.b32.xlu0 %v371_v15, %s1530_s6  ;;  %685 = vmatpush1.bf16.msra.mxu0 %v322_v35 }
  0xe6   : > { %1140 = vmatprep.mubr.msk.bf16.mxu1 %vm561_vm15, %v1326_v34 }
  0xe7   : > { %v1825_v37 = vpop.permute.xlu0 %307 }
  0xe8   : > { %487 = vrot.lane.b32.xlu1 %v1825_v37, %s1530_s6  ;;  %v311_v38 = vsel %vm309_vm5, %v306_v36, %v1825_v37  ;;  %v304_v39 = vpop.permute.xlu1 %303 }
  0xe9   : > { %513 = vrot.lane.b32.xlu0 %v370_v16, %s1530_s6  ;;  %686 = vmatprep.subr.bf16.mxu0 %v311_v38  ;;  %v310_v40 = vsel %vm309_vm5, %v304_v39, %v306_v36 }
  0xea   : > { %687 = vmatpush1.bf16.msra.mxu0 %v310_v40 }
  0xeb   : > { %v294_v41 = vpop.permute.xlu0 %293 }
  0xec   : > { %509 = vrot.lane.b32.xlu1 %v359_v19, %s1530_s6  ;;  %v1834_v42 = vpop.permute.xlu1 %295 }
  0xed   : > { %497 = vrot.lane.b32.xlu0 %v335_v29, %s1530_s6  ;;  %v299_v43 = vsel %vm297_vm6, %v294_v41, %v1834_v42 }
  0xee   : > { %688 = vmatprep.subr.bf16.mxu0 %v299_v43 }
  0xef   : > { %v292_v44 = vpop.permute.xlu0 %291 }
  0xf0   : > { %507 = vrot.lane.b32.xlu1 %v358_v20, %s1530_s6  ;;  %v450_v45 = vpop.permute.xlu1 %449  ;;  %v298_v46 = vsel %vm297_vm6, %v292_v44, %v294_v41  ;;  %v641_v44 = vld [vmem:[%s2130_s2] sm:$0xff] }
  0xf1   : > { %495 = vrot.lane.b32.xlu0 %v334_v30, %s1530_s6  ;;  %689 = vmatpush1.bf16.msra.mxu0 %v298_v46 }
  0xf2   : > { %690 = vmatprep.subr.bf16.mxu0 %v1724_v3 }
  0xf3   : > { %v1843_v47 = vpop.permute.xlu0 %451 }
  0xf4   : > { %503 = vrot.lane.b32.xlu1 %v347_v23, %s1530_s6  ;;  %v448_v48 = vpop.permute.xlu1 %447  ;;  %v455_v62 = vsel %vm453_vm8, %v450_v45, %v1843_v47 }
  0xf5   : > { %485 = vrot.lane.b32.xlu0 %v311_v38, %s1530_s6  ;;  %691 = vmatpush1.bf16.msra.mxu0 %v1734_v7  ;;  %v454_v12 = vsel %vm453_vm8, %v448_v48, %v450_v45  ;;  %v1921_v38 = vld [vmem:[%s2129_s1] ss:$16 sps:$4 sm:$0xff]   ;;  %v642_v45 = vld [vmem:[%s2130_s2 + $0x8] sm:$0xff] }
  0xf7   : > { %v438_v49 = vpop.permute.xlu0 %437 }
  0xf8   : > { %501 = vrot.lane.b32.xlu1 %v346_v26, %s1530_s6  ;;  %v1849_v50 = vpop.permute.xlu1 %439 }
  0xf9   : > { %483 = vrot.lane.b32.xlu0 %v310_v40, %s1530_s6  ;;  %v443_v59 = vsel %vm441_vm7, %v438_v49, %v1849_v50 }
  0xfb   : > { %v436_v51 = vpop.permute.xlu0 %435 }
  0xfc   : > { %491 = vrot.lane.b32.xlu1 %v323_v33, %s1530_s6  ;;  %v426_v52 = vpop.permute.xlu1 %425  ;;  %v442_v63 = vsel %vm441_vm7, %v436_v51, %v438_v49 }
  0xfd   : > { %481 = vrot.lane.b32.xlu0 %v1834_v42, %s1530_s6 }
  0xff   : > { %v1855_v53 = vpop.permute.xlu0 %427 }
 0x100   : > { %489 = vrot.lane.b32.xlu1 %v322_v35, %s1530_s6  ;;  %v424_v54 = vpop.permute.xlu1 %423  ;;  %v431_v19 = vsel %vm429_vm10, %v426_v52, %v1855_v53 }
 0x101   : > { %473 = vrot.lane.b32.xlu0 %v1724_v3, %s1530_s6  ;;  %v430_v26 = vsel %vm429_vm10, %v424_v54, %v426_v52 }
 0x103   : > { %v414_v55 = vpop.permute.xlu0 %413 }
 0x104   : > { %479 = vrot.lane.b32.xlu1 %v299_v43, %s1530_s6  ;;  %v1861_v56 = vpop.permute.xlu1 %415 }
 0x105   : > { %471 = vrot.lane.b32.xlu0 %v1734_v7, %s1530_s6  ;;  %v419_v15 = vsel %vm417_vm9, %v414_v55, %v1861_v56 }
 0x107   : > { %v412_v57 = vpop.permute.xlu0 %411 }
 0x108   : > { %477 = vrot.lane.b32.xlu1 %v298_v46, %s1530_s6  ;;  %v402_v58 = vpop.permute.xlu1 %401  ;;  %v418_v20 = vsel %vm417_vm9, %v412_v57, %v414_v55 }
 0x109   : > { %559 = vrot.lane.b32.xlu0 %v1843_v47, %s1530_s6 }
 0x10b   : > { %v1869_v60 = vpop.permute.xlu0 %403 }
 0x10c   : > { %475 = vrot.lane.b32.xlu1 %v1739_v8, %s1530_s6  ;;  %v400_v61 = vpop.permute.xlu1 %399  ;;  %v407_v30 = vsel %vm405_vm13, %v402_v58, %v1869_v60 }
 0x10d   : > { %551 = vrot.lane.b32.xlu0 %v443_v59, %s1530_s6  ;;  %v406_v33 = vsel %vm405_vm13, %v400_v61, %v402_v58 }
 0x10f   : > { %v390_v3 = vpop.permute.xlu0 %389 }
 0x110   : > { %557 = vrot.lane.b32.xlu1 %v455_v62, %s1530_s6  ;;  %v1876_v7 = vpop.permute.xlu1 %391 }
 0x111   : > { %549 = vrot.lane.b32.xlu0 %v442_v63, %s1530_s6  ;;  %v395_v29 = vsel %vm393_vm12, %v390_v3, %v1876_v7 }
 0x113   : > { %v388_v11 = vpop.permute.xlu0 %387 }
 0x114   : > { %555 = vrot.lane.b32.xlu1 %v454_v12, %s1530_s6  ;;  %v378_v14 = vpop.permute.xlu1 %377  ;;  %v394_v31 = vsel %vm393_vm12, %v388_v11, %v390_v3  ;;  %vm925_vm12 = vcmask 392192  }
 0x115   : > { %547 = vrot.lane.b32.xlu0 %v1855_v53, %s1530_s6 }
 0x117   : > { %v1883_v16 = vpop.permute.xlu0 %379 }
 0x118   : > { %553 = vrot.lane.b32.xlu1 %v1849_v50, %s1530_s6  ;;  %v376_v18 = vpop.permute.xlu1 %375  ;;  %v383_v35 = vsel %vm381_vm14, %v378_v14, %v1883_v16 }
 0x119   : > { %539 = vrot.lane.b32.xlu0 %v419_v15, %s1530_s6  ;;  %v382_v36 = vsel %vm381_vm14, %v376_v18, %v378_v14 }
 0x11b   : > { %v462_v21 = vpop.permute.xlu0 %461 }
 0x11c   : > { %545 = vrot.lane.b32.xlu1 %v431_v19, %s1530_s6  ;;  %v1891_v23 = vpop.permute.xlu1 %463 }
 0x11d   : > { %537 = vrot.lane.b32.xlu0 %v418_v20, %s1530_s6  ;;  %v467_v24 = vsel %vm465_vm11, %v462_v21, %v1891_v23 }
 0x11e   : > { %692 = vmatprep.subr.bf16.mxu0 %v467_v24 }
 0x11f   : > { %v460_v25 = vpop.permute.xlu0 %459 }
 0x120   : > { %543 = vrot.lane.b32.xlu1 %v430_v26, %s1530_s6  ;;  %v466_v28 = vsel %vm465_vm11, %v460_v25, %v462_v21 }
 0x121   : > { %693 = vmatpush2.bf16.msra.mxu0 %v466_v28  ;;  %535 = vrot.lane.b32.xlu0 %v1869_v60, %s1530_s6 }
 0x122   : > { %694 = vmatprep.subr.bf16.mxu0 %v455_v62 }
 0x124   : > { %541 = vrot.lane.b32.xlu1 %v1861_v56, %s1530_s6 }
 0x125   : > { %695 = vmatpush2.bf16.msra.mxu0 %v454_v12  ;;  %527 = vrot.lane.b32.xlu0 %v395_v29, %s1530_s6 }
 0x126   : > { %696 = vmatprep.subr.bf16.mxu0 %v443_v59 }
 0x128   : > { %533 = vrot.lane.b32.xlu1 %v407_v30, %s1530_s6 }
 0x129   : > { %697 = vmatpush2.bf16.msra.mxu0 %v442_v63  ;;  %525 = vrot.lane.b32.xlu0 %v394_v31, %s1530_s6 }
 0x12a   : > { %698 = vmatprep.subr.bf16.mxu0 %v431_v19 }
 0x12c   : > { %531 = vrot.lane.b32.xlu1 %v406_v33, %s1530_s6 }
 0x12d   : > { %699 = vmatpush2.bf16.msra.mxu0 %v430_v26  ;;  %523 = vrot.lane.b32.xlu0 %v1883_v16, %s1530_s6 }
 0x12e   : > { %700 = vmatprep.subr.bf16.mxu0 %v419_v15 }
 0x130   : > { %529 = vrot.lane.b32.xlu1 %v1876_v7, %s1530_s6 }
 0x131   : > { %701 = vmatpush2.bf16.msra.mxu0 %v418_v20  ;;  %645 = vperm.xlu0 %1319, %v641_v44  }
 0x132   : > { %702 = vmatprep.subr.bf16.mxu0 %v407_v30 }
 0x134   : > { %521 = vrot.lane.b32.xlu1 %v383_v35, %s1530_s6 }
 0x135   : > { %703 = vmatpush2.bf16.msra.mxu0 %v406_v33 }
 0x136   : > { %704 = vmatprep.subr.bf16.mxu0 %v395_v29 }
 0x138   : > { %519 = vrot.lane.b32.xlu1 %v382_v36, %s1530_s6 }
 0x139   : > { %705 = vmatpush2.bf16.msra.mxu0 %v394_v31 }
 0x13a   : > { %706 = vmatprep.subr.bf16.mxu0 %v383_v35 }
 0x13c   : > { %650 = vperm.xlu1 %1320, %v642_v45  }
 0x13d   : > { %707 = vmatpush2.bf16.msra.mxu0 %v382_v36 }
 0x13e   : > { %803 = vmatprep.subr.bf16.mxu0 %v1529_v10  ;;  %v518_v39 = vpop.permute.xlu1 %517 }
 0x140   : > { %709 = vmatmul.mubr.bf16.vlgmr.msra.gmra.mxu0 %v1921_v38 }
 0x141   : > { %804 = vmatpush1.bf16.msra.mxu0 %v518_v39  ;;  %1141 = vmatprep.mubr.msk.bf16.mxu0 %vm561_vm15, %v1326_v34 }
 0x142   : > { %805 = vmatprep.subr.bf16.mxu0 %v1529_v10  ;;  %v512_v40 = vpop.permute.xlu0 %511 }
 0x145   : > { %806 = vmatpush1.bf16.msra.mxu0 %v512_v40 }
 0x146   : > { %807 = vmatprep.subr.bf16.mxu0 %v1529_v10 }
 0x147   : > { %v506_v41 = vpop.permute.xlu0 %505 }
 0x149   : > { %808 = vmatpush1.bf16.msra.mxu0 %v506_v41 }
 0x14a   : > { %809 = vmatprep.subr.bf16.mxu0 %v1529_v10 }
 0x14e   : > { %v500_v43 = vpop.permute.xlu1 %499 }
 0x14f   : > { %810 = vmatpush1.bf16.msra.mxu0 %v500_v43 }
 0x150   : > { %811 = vmatprep.subr.bf16.mxu0 %v1529_v10 }
 0x153   : > { %v494_v46 = vpop.permute.xlu0 %493 }
 0x154   : > { %812 = vmatpush1.bf16.msra.mxu0 %v494_v46 }
 0x155   : > { %813 = vmatprep.subr.bf16.mxu0 %v1529_v10 }
 0x157   : > { %v516_v48 = vpop.permute.xlu0 %515 }
 0x158   : > { %v577_v49 = vsel %vm561_vm15, %v516_v48, %v518_v39 }
 0x159   : > { %719 = vmatprep.subr.bf16.mxu1 %v577_v49 }
 0x15a   : > { %v488_v51 = vpop.permute.xlu1 %487 }
 0x15b   : > { %v514_v52 = vpop.permute.xlu0 %513  ;;  %814 = vmatpush1.bf16.msra.mxu0 %v488_v51 }
 0x15c   : > { %v576_v54 = vsel %vm561_vm15, %v514_v52, %v516_v48  ;;  %815 = vmatprep.subr.bf16.mxu0 %v1529_v10 }
 0x15d   : > { %720 = vmatpush1.bf16.msra.mxu1 %v576_v54 }
 0x15e   : > { %v510_v55 = vpop.permute.xlu1 %509 }
 0x15f   : > { %v498_v57 = vpop.permute.xlu0 %497  ;;  %v575_v58 = vsel %vm561_vm15, %v510_v55, %v512_v40 }
 0x160   : > { %721 = vmatprep.subr.bf16.mxu1 %v575_v58  ;;  %v571_v18 = vsel %vm561_vm15, %v498_v57, %v500_v43 }
 0x162   : > { %v508_v59 = vpop.permute.xlu1 %507 }
 0x163   : > { %v496_v61 = vpop.permute.xlu0 %495  ;;  %v574_v62 = vsel %vm561_vm15, %v508_v59, %v510_v55 }
 0x164   : > { %722 = vmatpush1.bf16.msra.mxu1 %v574_v62  ;;  %v570_v20 = vsel %vm561_vm15, %v496_v61, %v498_v57 }
 0x166   : > { %v504_v63 = vpop.permute.xlu1 %503 }
 0x167   : > { %v486_v3 = vpop.permute.xlu0 %485  ;;  %v573_v11 = vsel %vm561_vm15, %v504_v63, %v506_v41 }
 0x168   : > { %723 = vmatprep.subr.bf16.mxu1 %v573_v11  ;;  %v567_v29 = vsel %vm561_vm15, %v486_v3, %v488_v51 }
 0x16a   : > { %v502_v12 = vpop.permute.xlu1 %501 }
 0x16b   : > { %v484_v14 = vpop.permute.xlu0 %483  ;;  %v572_v15 = vsel %vm561_vm15, %v502_v12, %v504_v63 }
 0x16c   : > { %724 = vmatpush1.bf16.msra.mxu1 %v572_v15  ;;  %v566_v31 = vsel %vm561_vm15, %v484_v14, %v486_v3 }
 0x16d   : > { %725 = vmatprep.subr.bf16.mxu1 %v571_v18 }
 0x16e   : > { %v492_v19 = vpop.permute.xlu1 %491 }
 0x16f   : > { %v569_v21 = vsel %vm561_vm15, %v492_v19, %v494_v46  ;;  %v482_v24 = vpop.permute.xlu0 %481 }
 0x170   : > { %726 = vmatpush1.bf16.msra.mxu1 %v570_v20  ;;  %816 = vmatpush1.bf16.msra.mxu0 %v482_v24 }
 0x171   : > { %727 = vmatprep.subr.bf16.mxu1 %v569_v21  ;;  %817 = vmatprep.subr.bf16.mxu0 %v1529_v10 }
 0x172   : > { %v490_v25 = vpop.permute.xlu1 %489 }
 0x173   : > { %v568_v26 = vsel %vm561_vm15, %v490_v25, %v492_v19  ;;  %v474_v28 = vpop.permute.xlu0 %473 }
 0x174   : > { %728 = vmatpush1.bf16.msra.mxu1 %v568_v26 }
 0x175   : > { %729 = vmatprep.subr.bf16.mxu1 %v567_v29 }
 0x176   : > { %v480_v30 = vpop.permute.xlu1 %479 }
 0x177   : > { %v565_v33 = vsel %vm561_vm15, %v480_v30, %v482_v24  ;;  %v472_v34 = vpop.permute.xlu0 %471 }
 0x178   : > { %730 = vmatpush1.bf16.msra.mxu1 %v566_v31  ;;  %v562_v44 = vsel %vm561_vm15, %v472_v34, %v474_v28  ;;  %v1324_v34 = vld [vmem:[%s2129_s1 + $0x8] ss:$16 sps:$4 sm:$0xff]  }
 0x179   : > { %731 = vmatprep.subr.bf16.mxu1 %v565_v33 }
 0x17a   : > { %v478_v35 = vpop.permute.xlu1 %477 }
 0x17b   : > { %v564_v36 = vsel %vm561_vm15, %v478_v35, %v480_v30  ;;  %v560_v39 = vpop.permute.xlu0 %559 }
 0x17c   : > { %732 = vmatpush1.bf16.msra.mxu1 %v564_v36 }
 0x17e   : > { %v476_v40 = vpop.permute.xlu1 %475 }
 0x17f   : > { %818 = vmatpush1.bf16.msra.mxu0 %v476_v40  ;;  %v563_v41 = vsel %vm561_vm15, %v474_v28, %v476_v40  ;;  %v552_v43 = vpop.permute.xlu0 %551 }
 0x180   : > { %733 = vmatprep.subr.bf16.mxu1 %v563_v41  ;;  %821 = vmatprep.subr.bf16.mxu0 %v1529_v10 }
 0x181   : > { %734 = vmatpush1.bf16.msra.mxu1 %v562_v44 }
 0x182   : > { %v558_v45 = vpop.permute.xlu1 %557 }
 0x183   : > { %822 = vmatpush2.bf16.msra.mxu0 %v560_v39  ;;  %v591_v46 = vsel %vm561_vm15, %v558_v45, %v560_v39  ;;  %v550_v48 = vpop.permute.xlu0 %549 }
 0x184   : > { %737 = vmatprep.subr.bf16.mxu1 %v591_v46  ;;  %823 = vmatprep.subr.bf16.mxu0 %v1529_v10  ;;  %v588_v58 = vsel %vm561_vm15, %v550_v48, %v552_v43 }
 0x186   : > { %v556_v49 = vpop.permute.xlu1 %555 }
 0x187   : > { %v590_v51 = vsel %vm561_vm15, %v556_v49, %v558_v45  ;;  %v548_v52 = vpop.permute.xlu0 %547 }
 0x188   : > { %738 = vmatpush2.bf16.msra.mxu1 %v590_v51 }
 0x18a   : > { %v554_v54 = vpop.permute.xlu1 %553 }
 0x18b   : > { %824 = vmatpush2.bf16.msra.mxu0 %v554_v54  ;;  %v589_v55 = vsel %vm561_vm15, %v552_v43, %v554_v54  ;;  %v540_v57 = vpop.permute.xlu0 %539 }
 0x18c   : > { %739 = vmatprep.subr.bf16.mxu1 %v589_v55  ;;  %825 = vmatprep.subr.bf16.mxu0 %v1529_v10 }
 0x18d   : > { %740 = vmatpush2.bf16.msra.mxu1 %v588_v58 }
 0x18e   : > { %v546_v59 = vpop.permute.xlu1 %545 }
 0x18f   : > { %826 = vmatpush2.bf16.msra.mxu0 %v548_v52  ;;  %v587_v61 = vsel %vm561_vm15, %v546_v59, %v548_v52  ;;  %v538_v62 = vpop.permute.xlu0 %537 }
 0x190   : > { %741 = vmatprep.subr.bf16.mxu1 %v587_v61  ;;  %827 = vmatprep.subr.bf16.mxu0 %v1529_v10  ;;  %v584_v15 = vsel %vm561_vm15, %v538_v62, %v540_v57 }
 0x192   : > { %v544_v63 = vpop.permute.xlu1 %543 }
 0x193   : > { %v586_v3 = vsel %vm561_vm15, %v544_v63, %v546_v59  ;;  %v536_v11 = vpop.permute.xlu0 %535 }
 0x194   : > { %742 = vmatpush2.bf16.msra.mxu1 %v586_v3 }
 0x196   : > { %v542_v12 = vpop.permute.xlu1 %541 }
 0x197   : > { %828 = vmatpush2.bf16.msra.mxu0 %v542_v12  ;;  %v585_v14 = vsel %vm561_vm15, %v540_v57, %v542_v12  ;;  %v528_v18 = vpop.permute.xlu0 %527 }
 0x198   : > { %743 = vmatprep.subr.bf16.mxu1 %v585_v14  ;;  %829 = vmatprep.subr.bf16.mxu0 %v1529_v10 }
 0x199   : > { %744 = vmatpush2.bf16.msra.mxu1 %v584_v15 }
 0x19a   : > { %v534_v19 = vpop.permute.xlu1 %533 }
 0x19b   : > { %830 = vmatpush2.bf16.msra.mxu0 %v536_v11  ;;  %v583_v20 = vsel %vm561_vm15, %v534_v19, %v536_v11  ;;  %v526_v25 = vpop.permute.xlu0 %525 }
 0x19c   : > { %745 = vmatprep.subr.bf16.mxu1 %v583_v20  ;;  %831 = vmatprep.subr.bf16.mxu0 %v1529_v10  ;;  %v580_v30 = vsel %vm561_vm15, %v526_v25, %v528_v18 }
 0x19e   : > { %v532_v21 = vpop.permute.xlu1 %531 }
 0x19f   : > { %v582_v24 = vsel %vm561_vm15, %v532_v21, %v534_v19  ;;  %v524_v29 = vpop.permute.xlu0 %523 }
 0x1a0   : > { %746 = vmatpush2.bf16.msra.mxu1 %v582_v24 }
 0x1a2   : > { %v530_v26 = vpop.permute.xlu1 %529 }
 0x1a3   : > { %832 = vmatpush2.bf16.msra.mxu0 %v530_v26  ;;  %v581_v28 = vsel %vm561_vm15, %v528_v18, %v530_v26 }
 0x1a4   : > { %747 = vmatprep.subr.bf16.mxu1 %v581_v28  ;;  %833 = vmatprep.subr.bf16.mxu0 %v1529_v10 }
 0x1a5   : > { %748 = vmatpush2.bf16.msra.mxu1 %v580_v30 }
 0x1a6   : > { %v522_v31 = vpop.permute.xlu1 %521 }
 0x1a7   : > { %834 = vmatpush2.bf16.msra.mxu0 %v524_v29  ;;  %v579_v33 = vsel %vm561_vm15, %v522_v31, %v524_v29 }
 0x1a8   : > { %749 = vmatprep.subr.bf16.mxu1 %v579_v33 }
 0x1aa   : > { %v520_v35 = vpop.permute.xlu1 %519  ;;  %836 = vmatmul.mubr.bf16.vlgmr.msra.gmra.mxu0 %v1324_v34 }
 0x1ab   : > { %v578_v36 = vsel %vm561_vm15, %v520_v35, %v522_v31 }
 0x1ac   : > { %750 = vmatpush2.bf16.msra.mxu1 %v578_v36 }
 0x1ad   : > { %1157 = vmatprep.subr.bf16.mxu1 %v1891_v23 }
 0x1af   : > { %752 = vmatmul.mubr.bf16.vlgmr.msra.gmra.mxu1 %v1324_v34 }
 0x1b0   : > { %1158 = vmatpush3.bf16.msra.mxu1 %v1799_v13  ;;  %794 = vmatprep.mubr.bf16.mxu1 %v1794_v9 }
 0x1b1   : > { %1159 = vmatprep.subr.bf16.mxu1 %v1843_v47 }
 0x1b4   : > { %1160 = vmatpush3.bf16.msra.mxu1 %v1804_v17 }
 0x1b5   : > { %1161 = vmatprep.subr.bf16.mxu1 %v1849_v50  ;;  %v646_v50 = vpop.permute.xlu0 %645 }
 0x1b8   : > { %1162 = vmatpush3.bf16.msra.mxu1 %v1809_v22  ;;  %v851_v22 = vlaneseq }
 0x1b9   : > { %1163 = vmatprep.subr.bf16.mxu1 %v1855_v53 }
 0x1bc   : > { %1164 = vmatpush3.bf16.msra.mxu1 %v1814_v27 }
 0x1bd   : > { %1165 = vmatprep.subr.bf16.mxu1 %v1861_v56 }
 0x1c0   : > { %1166 = vmatpush3.bf16.msra.mxu1 %v1819_v32  ;;  %v852_v32 = vand.u32 127, %v851_v22 }
 0x1c1   : > { %1167 = vmatprep.subr.bf16.mxu1 %v1869_v60 }
 0x1c2   : > { %v853_v60 = vadd.s32 128, %v852_v32  ;;  %v854_v18 = vadd.s32 256, %v852_v32 }
 0x1c4   : > { %1168 = vmatpush3.bf16.msra.mxu1 %v1825_v37  ;;  %v855_v37 = vstv %s1142_s17 }
 0x1c5   : > { %1169 = vmatprep.subr.bf16.mxu1 %v1876_v7  ;;  %v856_v53 = vadd.s32 %v855_v37, %v852_v32  ;;  %v651_v7 = vpop.permute.xlu1 %650  ;;  %v857_v40 = vadd.s32 %v855_v37, %v853_v60  ;;  %v858_v25 = vadd.s32 %v855_v37, %v854_v18 }
 0x1c7   : > { %vm859_vm0 = vcmp.ge.s32.totalorder %v856_v53, 0  ;;  %vm862_vm1 = vcmp.lt.s32.totalorder %v856_v53, 1024  ;;  %vm860_vm3 = vcmp.ge.s32.totalorder %v857_v40, 0  ;;  %vm863_vm4 = vcmp.lt.s32.totalorder %v857_v40, 1024 }
 0x1c8   : > { %1170 = vmatpush3.bf16.msra.mxu1 %v1834_v42  ;;  %vm2000_vm2 = vmand %vm859_vm0, %vm862_vm1  ;;  %vm861_vm8 = vcmp.ge.s32.totalorder %v858_v25, 0  ;;  %vm864_vm9 = vcmp.lt.s32.totalorder %v858_v25, 1024 }
 0x1c9   : > { %1171 = vmatprep.subr.bf16.mxu1 %v1883_v16  ;;  %vm2008_vm7 = vmand %vm860_vm3, %vm863_vm4 }
 0x1ca   : > { %vm867_vm10 = vmand %vm861_vm8, %vm864_vm9 }
 0x1cb   : > { %vm1144_vm11 = vmpackc.low %vm2008_vm7, %vm2008_vm7 }
 0x1cc   : > { %1172 = vmatpush3.bf16.msra.mxu1 %v1739_v8 }
 0x1cf   : > { %795 = vmatmul.mubr.bf16.vlgmr.msra.gmra.mxu1 %v1921_v38 }
 0x1d0   : > { %961 = vmatprep.mubr.bf16.mxu1 %v1529_v10 }
 0x200   : > { %v710_v9 = vpop.f32.mrf.mxu0 }
 0x201   : > { %v711_v56 = vadd.f32 %v710_v9, %v646_v50 }
 0x202   : > { %v712_v13 = vpop.f32.mrf.mxu0 }
 0x203   : > { %v713_v39 = vadd.f32 %v712_v13, %v646_v50  ;;  %v908_v13 = vld [vmem:[%s2132_s4] sm:$0xff] }
 0x204   : > { %v714_v17 = vpop.f32.mrf.mxu0 }
 0x205   : > { %v715_v41 = vadd.f32 %v714_v17, %v651_v7  ;;  %v909_v17 = vld [vmem:[%s2132_s4 + $0x8] sm:$0xff] }
 0x206   : > { %v716_v27 = vpop.f32.mrf.mxu0 }
 0x207   : > { %v717_v49 = vadd.f32 %v716_v27, %v651_v7 }
 0x26a   : > { %v837_v47 = vpop.f32.mrf.mxu0 }
 0x26c   : > { %v839_v42 = vpop.f32.mrf.mxu0 }
 0x26e   : > { %v840_v8 = vpop.f32.mrf.mxu0 }
 0x26f   : > { %v753_v16 = vpop.f32.mrf.mxu1 }
 0x270   : > { %v754_v23 = vadd.f32 %v753_v16, %v711_v56  ;;  %v842_v10 = vpop.f32.mrf.mxu0 }
 0x271   : > { %v755_v38 = vpop.f32.mrf.mxu1 }
 0x272   : > { %v844_v43 = vmax.f32 %v754_v23, 0.0  ;;  %v756_v46 = vadd.f32 %v755_v38, %v713_v39 }
 0x273   : > { %v757_v44 = vpop.f32.mrf.mxu1 }
 0x274   : > { %v758_v48 = vadd.f32 %v757_v44, %v715_v41  ;;  %v874_v55 = vsel %vm2000_vm2, %v844_v43, 0.0  ;;  %v845_v57 = vmax.f32 %v756_v46, 0.0 }
 0x275   : > { %v759_v51 = vpop.f32.mrf.mxu1 }
 0x276   : > { %v847_v52 = vmax.f32 %v758_v48, 0.0  ;;  %v760_v54 = vadd.f32 %v759_v51, %v717_v49  ;;  %v875_v12 = vsel %vm2008_vm7, %v845_v57, 0.0 }
 0x278   : > { %v877_v58 = vsel %vm2000_vm2, %v847_v52, 0.0  ;;  %v1148_v59 = vpack.c.bf16 %v847_v52, %v844_v43  ;;  %v848_v61 = vmax.f32 %v760_v54, 0.0 }
 0x279   : > { %v880_v63 = vpack.c.bf16 %v877_v58, %v874_v55 }
 0x27a   : > { %v878_v3 = vsel %vm2008_vm7, %v848_v61, 0.0  ;;  %v1145_v11 = vpack.c.bf16 %v848_v61, %v845_v57 }
 0x27b   : > { %896 = vrot.lane.b32.xlu1 %v880_v63, %s1519_s29  ;;  %v881_v14 = vpack.c.bf16 %v878_v3, %v875_v12 }
 0x27f   : > { %898 = vrot.lane.b32.xlu1 %v881_v14, %s1519_s29 }
 0x28f   : > { %v1173_v15 = vpop.f32.mrf.mxu1 }
 0x291   : > { %v1174_v19 = vpop.f32.mrf.mxu1 }
 0x292   : > { %v1175_v20 = vadd.f32 %v1174_v19, %v1173_v15 }
 0x293   : > { %v1176_v21 = vpop.f32.mrf.mxu1 }
 0x294   : > { %v797_v24 = vadd.f32 %v1175_v20, %v646_v50 }
 0x295   : > { %v1177_v26 = vpop.f32.mrf.mxu1 }
 0x296   : > { %v838_v28 = vadd.f32 %v837_v47, %v797_v24  ;;  %v1178_v29 = vadd.f32 %v1177_v26, %v1176_v21 }
 0x298   : > { %v800_v30 = vadd.f32 %v1178_v29, %v651_v7  ;;  %v846_v31 = vmax.f32 %v838_v28, 0.0 }
 0x29a   : > { %v841_v33 = vadd.f32 %v840_v8, %v800_v30  ;;  %v876_v35 = vsel %vm867_vm10, %v846_v31, 0.0 }
 0x29c   : > { %v849_v34 = vmax.f32 %v841_v33, 0.0 }
 0x29e   : > { %v879_v36 = vsel %vm867_vm10, %v849_v34, 0.0 }
 0x29f   : > { %v882_v9 = vpack.c.bf16 %v879_v36, %v876_v35 }
 0x2a1   : > { %900 = vrot.lane.b32.xlu0 %v882_v9, %s1519_s29  ;;  %890 = vrot.lane.b32.xlu1 %v882_v9, %s1520_s18  ;;  %s2165_s29 = sld [smem:[#allocation12_spill]] }
 0x2a5   : > { %888 = vrot.lane.b32.xlu0 %v881_v14, %s1520_s18  ;;  %912 = vperm.xlu1 %1320, %v908_v13  }
 0x2a7   : > { %s1153_s21 = sshll.u32 %s2165_s29, 4 }
 0x2a8   : > { %s1023_s7 = sadd.s32 %s1153_s21, %s1152_s8 }
 0x2a9   : > { %886 = vrot.lane.b32.xlu0 %v880_v63, %s1520_s18  ;;  %982 = vrot.lane.b32.xlu1 %v1720_v2, %s1530_s6  ;;  %s269_s18 = sand.u32 1, %s1470_s19   ;;  %s1154_s9 = sshll.u32 %s1023_s7, 7 }
 0x2aa   : > { %s2064_s16 = scalar_lea.hbm %s2167_s15, %s1154_s9  ;;  %s2068_s17 = scalar_lea.sflag [#allocation4], %s269_s18 }
 0x2ad   : > { %917 = vperm.xlu0 %1319, %v909_v17   ;;  %986 = vrot.lane.b32.xlu1 %v1728_v5, %s1530_s6 }
 0x2b1   : > { %984 = vrot.lane.b32.xlu0 %v1716_v0, %s1530_s6  ;;  %990 = vrot.lane.b32.xlu1 %v1718_v1, %s1530_s6 }
 0x2b5   : > { %988 = vrot.lane.b32.xlu0 %v1726_v4, %s1530_s6 }
 0x2b9   : > { %992 = vrot.lane.b32.xlu0 %v1730_v6, %s1530_s6  ;;  %v1327_v6 = vld [vmem:[#allocation5] sm:$0xff]   ;;  %s1133_s6 = sshll.u32 %s269_s18, 5 }
 0x2ba   : > { %s271_s12 = scalar_lea.vmem [#allocation7], %s1133_s6 }
 0x2bb   : > { %s1026_s10 = sshll.u32 %s271_s12, 4  ;;  %s2059_s10 = int_to_ptr.vmem [resolvable:$true] %s1026_s10 }
 0x2bc   : > { %s1382_s5 = scalar_lea.vmem %s2059_s10, 512  ;;  %p1389_p13 = scmp.lt.s32.totalorder %s2059_s10, %s1387_s11 }
 0x2bd   : > { %p1383_p1 = scmp.ne.s32.totalorder %s2059_s10, %s1382_s5  ;;  %p1390_p5 = scmp.lt.s32.totalorder %s1388_s30, %s1382_s5 }
 0x2bf   : > { %p1384_p11 = pnand %p1383_p1, %p2168_p3  ;;  %p1391_p6 = por %p1390_p5, %p1389_p13 }
 0x2c1   : > { %p1385_p0 = pneg %p1384_p11 }
 0x2c3   : > { %p1392_p8 = pnand %p1391_p6, %p1385_p0 }
 0x2ed   : > { %v897_v2 = vpop.permute.xlu1 %896 }
 0x2f1   : > { %v899_v22 = vpop.permute.xlu1 %898 }
 0x2f2   : > { %v902_v37 = vsel %vm309_vm5, %v897_v2, %v899_v22 }
 0x313   : > { %v901_v27 = vpop.permute.xlu0 %900  ;;  %v891_v5 = vpop.permute.xlu1 %890 }
 0x314   : > { %v903_v32 = vsel %vm309_vm5, %v899_v22, %v901_v27  ;;  %vm1147_vm5 = vmpackc.low %vm2000_vm2, %vm2000_vm2 }
 0x315   : > { %939 = vmatprep.subr.bf16.mxu1 %v903_v32 }
 0x316   : > { %940 = vmatpush1.bf16.msra.mxu1 %v902_v37 }
 0x317   : > { %v889_v0 = vpop.permute.xlu0 %888 }
 0x318   : > { %v893_v47 = vsel %vm297_vm6, %v889_v0, %v891_v5 }
 0x319   : > { %941 = vmatprep.subr.bf16.mxu1 %v893_v47 }
 0x31b   : > { %v887_v1 = vpop.permute.xlu0 %886 }
 0x31c   : > { %v892_v4 = vsel %vm297_vm6, %v887_v1, %v889_v0 }
 0x31d   : > { %942 = vmatpush1.bf16.msra.mxu1 %v892_v4 }
 0x31e   : > { %1146 = vmatprep.subr.msk.bf16.mxu1 %vm1144_vm11, %v1145_v11 }
 0x320   : > { %v913_v50 = vpop.permute.xlu1 %912 }
 0x321   : > { %1149 = vmatpush1.bf16.msk.msra.mxu1 %vm1147_vm5, %v1148_v59 }
 0x324   : > { %1150 = vmatmul.mubr.msk.bf16.vlgmr.msra.gmra.mxu1 %vm925_vm12, %v1327_v6  ;;  %v983_v53 = vpop.permute.xlu1 %982 }
 0x328   : > { %v918_v42 = vpop.permute.xlu0 %917  ;;  %v987_v60 = vpop.permute.xlu1 %986 }
 0x32c   : > { %v985_v56 = vpop.permute.xlu0 %984  ;;  %v991_v45 = vpop.permute.xlu1 %990 }
 0x32d   : > { %v994_v39 = vsel %vm561_vm15, %v983_v53, %v985_v56  ;;  %v995_v48 = vsel %vm561_vm15, %v985_v56, %v987_v60 }
 0x330   : > { %v989_v8 = vpop.permute.xlu0 %988 }
 0x331   : > { %v996_v55 = vsel %vm561_vm15, %v989_v8, %v991_v45 }
 0x334   : > { %v993_v46 = vpop.permute.xlu0 %992 }
 0x335   : > { %v997_v57 = vsel %vm561_vm15, %v991_v45, %v993_v46 }
 0x3e4   : > { %v963_v7 = vpop.f32.mrf.mxu1 }
 0x3e5   : > { %v964_v16 = vadd.f32 %v963_v7, %v913_v50 }
 0x3e6   : > { %v965_v23 = vpop.f32.mrf.mxu1 }
 0x3e7   : > { %v972_v10 = vmax.f32 %v964_v16, 0.0  ;;  %v966_v38 = vadd.f32 %v965_v23, %v913_v50 }
 0x3e8   : > { %v967_v40 = vpop.f32.mrf.mxu1 }
 0x3e9   : > { %v1002_v41 = vadd.f32 %v994_v39, %v972_v10  ;;  %v973_v43 = vmax.f32 %v966_v38, 0.0  ;;  %v968_v44 = vadd.f32 %v967_v40, %v918_v42 }
 0x3ea   : > { %v969_v49 = vpop.f32.mrf.mxu1 }
 0x3eb   : > { %1006 = vst [vmem:[%s271_s12] sm:$0xff] %v1002_v41  ;;  %v1003_v51 = vadd.f32 %v995_v48, %v973_v43  ;;  %v974_v52 = vmax.f32 %v968_v44, 0.0  ;;  %v970_v54 = vadd.f32 %v969_v49, %v918_v42 }
 0x3ed   : > { %1007 = vst [vmem:[%s271_s12 + $0x8] sm:$0xff] %v1003_v51  ;;  %v1004_v58 = vadd.f32 %v996_v55, %v974_v52  ;;  %v975_v59 = vmax.f32 %v970_v54, 0.0 }
 0x3ef   : > { %1008 = vst [vmem:[%s271_s12 + $0x10] sm:$0xff] %v1004_v58  ;;  %v1005_v61 = vadd.f32 %v997_v57, %v975_v59 }
 0x3f1   : > { %1009 = vst [vmem:[%s271_s12 + $0x18] sm:$0xff] %v1005_v61 }
 0x3f2   : > { %1395 = shalt.err (!%p1392_p8)
}
 0x3f3   : > { %s1396_s29 = scalar_lea.hbm %s2064_s16, 512  ;;  %s1400_s8 = scalar_lea.hbm %s2167_s15, 4096 }
 0x3f4   : > { %p1397_p7 = scmp.ne.s32.totalorder %s2064_s16, %s1396_s29  ;;  %p1401_p12 = scmp.lt.s32.totalorder %s2064_s16, %s2167_s15 }
 0x3f5   : > { %p1402_p2 = scmp.lt.s32.totalorder %s1400_s8, %s1396_s29 }
 0x3f6   : > { %p1398_p9 = pnand %p1397_p7, %p2168_p3 }
 0x3f7   : > { %p1403_p4 = por %p1402_p2, %p1401_p12 }
 0x3f8   : > { %p1399_p10 = pneg %p1398_p9 }
 0x3fa   : > { %p1404_p1 = pnand %p1403_p4, %p1399_p10 }
 0x3fc   : > { %1407 = shalt.err (!%p1404_p1)
}
 0x3fd   : > { %s1532_s12 = smov 256   ;;  %s1533_s9 = smov 1024  }
 0x3fe   : > { %s1534_s14 = smov 16  }
 0x3ff   : > { %1188 = dma.vmem_to_hbm [thread:$0]  (%p2168_p3), %s2059_s10, 512, %s2064_s16, %s2068_s17, %s1532_s12, %s1533_s9, %s1534_s14  }
 0x400 PF: > { %s2169_s13 = sld [smem:[#allocation11_spill]]  ;;  %p1205_p11 = scmp.ge.s32.totalorder %s1506_s28, 2 }
 0x401   : > { %s2170_s5 = sld [smem:[#allocation15_spill]] }
 0x406   : > { %s1041_s25 = sand.u32 1, %s2169_s13  }
 0x407   : > { %p2171_p0 = scmp.ne.s32.totalorder %s2170_s5, 0  ;;  %s1042_s11 = scalar_lea.sflag [#allocation4], %s1041_s25 }
 0x409   : > { %p1199_p13 = pnand %p1205_p11, %p2171_p0 }
 0x40b   : > { %p1200_p5 = pneg %p1199_p13 }
 0x40d   : > { %1461 = dma.done.wait (%p1200_p5), %s1042_s11, 512  }
 0x40e   : > { %1463 = vsyncadd (%p1200_p5), %s1042_s11, 4294966784  ;;  %s22_s28 = sadd.s32 1, %s1506_s28   ;;  %s2172_s24 = sld [smem:[#allocation13_spill]] }
 0x40f   : > { %p19_p6 = scmp.ge.s32.totalorder %s22_s28, 10   ;;  %s2173_s10 = sld [smem:[#allocation16_spill]] }
 0x410   : > { %s2174_s16 = sld [smem:[#allocation17_spill]]  ;;  %s2175_s18 = smov %s1470_s19 }
 0x411   : > { %s2176_s19 = smov %s1474_s20  ;;  %s2177_s20 = smov %s1685_s26 }
 0x412   : > { %s2178_s21 = smov %s1482_s22  ;;  %s2179_s22 = smov %s1486_s23 }
 0x413   : > { %s2180_s23 = smov %s1680_s3  ;;  %s2181_s25 = smov %s1502_s27 }
 0x414   :  { %21 = sbr.rel (!%p19_p6) target bundleno = 13 (0xd), region = 90 }
 0x415   : > { %s2182_s26 = smov %s2173_s10 }
 0x416   : > { %s2183_s27 = smov %s2174_s16 }
 0x419   :  { %1047 = vsyncpa [#allocation3], 1 }
 0x41a   :  { %1049 = vsyncpa [#allocation3 + $0x1], 1 }
 0x41b   :  { %1050 = vsyncpa [#allocation6], 1 }
 0x41c   :  { %1051 = vsyncpa [#allocation4], 1 }
 0x41d   :  { %1053 = vsyncpa [#allocation4 + $0x1], 1 }

</bundles_post_ra>
